<compile_context>
chip_gen: v7x
topology: tpu7x:2x2x1
jax: 0.10.0
libtpu: 0.0.40
codegen_flags: <defaults>
</compile_context>

<pallas_src>
import jax
import jax.numpy as jnp
from jax.experimental import pallas as pl
from jax.experimental.pallas import tpu as pltpu


IN_DIM = 6        # fc1 input features (hard-coded in the PyTorch module)
PAD_IN = 8        # feature dim padded to the f32 sublane tile
HIDDEN = 128


def actor_kernel(x_ref, w1_ref, b2_ref, w2_ref, b3_ref, w3_ref, o_ref):
    x = x_ref[...]                       # (tb, 8) f32: [state(6), 1.0, 0.0]
    w1 = w1_ref[...]                     # (8, 128) f32: [fc1.W(6), fc1.b, 0]

    # ---- Layer 1 on the VPU: K=6 (+bias row) -> 7 broadcast FMAs, no MXU. ----
    h1 = x[:, 0:1] * w1[0:1, :]
    for k in range(1, IN_DIM + 1):       # static unroll; k == IN_DIM is the bias
        h1 = h1 + x[:, k:k + 1] * w1[k:k + 1, :]
    h1 = jnp.maximum(h1, 0.0)            # ReLU in f32

    # ---- Layers 2/3 on the MXU: bf16 operands, f32 accumulation. ----
    h2 = jnp.dot(h1.astype(jnp.bfloat16), w2_ref[...],
                 preferred_element_type=jnp.float32) + b2_ref[...]
    h2 = jnp.maximum(h2, 0.0)            # ReLU in f32

    o = jnp.dot(h2.astype(jnp.bfloat16), w3_ref[...],
                preferred_element_type=jnp.float32) + b3_ref[...]
    o_ref[...] = jnp.tanh(o).astype(o_ref.dtype)   # tanh squashing in f32


def _default_batch_tile(B):
    """Largest multiple-of-8 divisor of B that is <= min(1024, B // 2)."""
    if B % 8 != 0:
        return B                         # tiny / ragged batch: single full block
    cap = min(1024, max(8, B // 2))
    d = cap - (cap % 8)
    while d >= 8:
        if B % d == 0:
            return d
        d -= 8
    return B


def actor_forward(state, params, *, batch_tile=None):
    """Fused Actor MLP.

    state:  f32[B, 6]
    params: dict with w1[6,128], b1[1,128], w2[128,128], b2[1,128],
            w3[128,A], b3[1,A]   (all f32, stored [in, out] so the kernel
            computes x @ W + b, matching PyTorch's x @ W.T + b).
    """
    B, in_dim = state.shape
    assert in_dim == IN_DIM
    action_dim = params["w3"].shape[1]

    tb = batch_tile if batch_tile is not None else _default_batch_tile(B)
    assert B % tb == 0, "batch_tile must divide the batch"
    assert tb % 8 == 0 or tb == B, "batch_tile must be a multiple of 8 (or == B)"

    grid = (B // tb,)

    # Sublane-aligned feature padding; column 6 is a constant 1 so that the
    # matching w1 row carries the fc1 bias (bias folded into the FMA loop).
    x32 = state.astype(jnp.float32)
    ones = jnp.ones((B, 1), jnp.float32)
    zeros_x = jnp.zeros((B, PAD_IN - IN_DIM - 1), jnp.float32)
    x_p = jnp.concatenate([x32, ones, zeros_x], axis=1)            # (B, 8)

    w1_p = jnp.concatenate(
        [params["w1"].astype(jnp.float32),
         params["b1"].astype(jnp.float32).reshape(1, HIDDEN),
         jnp.zeros((PAD_IN - IN_DIM - 1, HIDDEN), jnp.float32)],
        axis=0)                                                    # (8, 128)

    w2 = params["w2"].astype(jnp.bfloat16)                         # bf16 MXU operands
    b2 = params["b2"].astype(jnp.float32).reshape(1, HIDDEN)
    w3 = params["w3"].astype(jnp.bfloat16)
    b3 = params["b3"].astype(jnp.float32).reshape(1, action_dim)

    batch_map = lambda i: (i, 0)
    const_map = lambda i: (0, 0)

    return pl.pallas_call(
        actor_kernel,
        out_shape=jax.ShapeDtypeStruct((B, action_dim), jnp.float32),
        grid_spec=pltpu.PrefetchScalarGridSpec(
            num_scalar_prefetch=0,
            grid=grid,
            in_specs=[
                pl.BlockSpec((tb, PAD_IN), batch_map),      # state tile
                pl.BlockSpec(w1_p.shape, const_map),        # w1 (+bias row)
                pl.BlockSpec(b2.shape, const_map),          # b2
                pl.BlockSpec(w2.shape, const_map),          # w2 (bf16)
                pl.BlockSpec(b3.shape, const_map),          # b3
                pl.BlockSpec(w3.shape, const_map),          # w3 (bf16)
            ],
            out_specs=pl.BlockSpec((tb, action_dim), batch_map),
        ),
        compiler_params=pltpu.CompilerParams(
            dimension_semantics=("parallel",),
        ),
    )(x_p, w1_p, b2, w2, b3, w3)


def init_params(key, action_dim):
    """Deterministic synthetic parameters matching the PyTorch module shapes."""
    k1, k2, k3, k4, k5, k6 = jax.random.split(key, 6)

    def linear(kw, kb, fan_in, fan_out):
        # PyTorch default init: U(-1/sqrt(fan_in), 1/sqrt(fan_in))
        bound = 1.0 / jnp.sqrt(jnp.float32(fan_in))
        w = jax.random.uniform(kw, (fan_in, fan_out), jnp.float32, -bound, bound)
        b = jax.random.uniform(kb, (1, fan_out), jnp.float32, -bound, bound)
        return w, b

    w1, b1 = linear(k1, k2, IN_DIM, HIDDEN)
    w2, b2 = linear(k3, k4, HIDDEN, HIDDEN)
    w3, b3 = linear(k5, k6, HIDDEN, action_dim)
    return {"w1": w1, "b1": b1, "w2": w2, "b2": b2, "w3": w3, "b3": b3}


def actor_reference_f32(state, params):
    """Pure f32 reference (matches the PyTorch module numerics)."""
    h1 = jnp.maximum(state @ params["w1"] + params["b1"], 0.0)
    h2 = jnp.maximum(h1 @ params["w2"] + params["b2"], 0.0)
    return jnp.tanh(h2 @ params["w3"] + params["b3"])


def actor_reference_bf16(state, params):
    """Reference matching the kernel precision (bf16 MXU operands, f32 accum)."""
    h1 = jnp.maximum(state @ params["w1"] + params["b1"], 0.0)
    h2 = jnp.dot(h1.astype(jnp.bfloat16), params["w2"].astype(jnp.bfloat16),
                 preferred_element_type=jnp.float32) + params["b2"]
    h2 = jnp.maximum(h2, 0.0)
    o = jnp.dot(h2.astype(jnp.bfloat16), params["w3"].astype(jnp.bfloat16),
                preferred_element_type=jnp.float32) + params["b3"]
    return jnp.tanh(o)


if __name__ == "__main__":
    key = jax.random.PRNGKey(0)
    k_param, k_state = jax.random.split(key)

    action_dim = 4
    params = init_params(k_param, action_dim)

    # Small batch (single grid step) and a larger one that exercises the
    # multi-step (pipelined / megacore-shardable) path.
    for batch in (8, 64):
        state = jax.random.normal(k_state, (batch, IN_DIM), jnp.float32)

        out = actor_forward(state, params)
        out = jax.block_until_ready(out)
        assert out.shape == (batch, action_dim)

        ref_bf16 = actor_reference_bf16(state, params)
        ref_f32 = actor_reference_f32(state, params)
        assert jnp.allclose(out, ref_bf16, atol=5e-3, rtol=1e-3), \
            "mismatch vs bf16-matched reference"
        assert jnp.allclose(out, ref_f32, atol=5e-2, rtol=5e-2), \
            "mismatch vs f32 reference"

    print("KERNEL_OK")
</pallas_src>

<mosaic_0001>
module attributes {stable_mosaic.version = 11 : i64} {
  func.func @actor_kernel(%arg0: i32, %arg1: memref<8x8xf32, #tpu.memory_space<vmem>>, %arg2: memref<8x128xf32, #tpu.memory_space<vmem>>, %arg3: memref<1x128xf32, #tpu.memory_space<vmem>>, %arg4: memref<128x128xbf16, #tpu.memory_space<vmem>>, %arg5: memref<1x4xf32, #tpu.memory_space<vmem>>, %arg6: memref<128x4xbf16, #tpu.memory_space<vmem>>, %arg7: memref<8x4xf32, #tpu.memory_space<vmem>>) attributes {dimension_semantics = [#tpu.dimension_semantics<parallel>], iteration_bounds = array<i64: 1>, scalar_prefetch = 0 : i64, scratch_operands = 0 : i64, tpu.core_type = #tpu.core_type<tc>, window_params = [{transform_indices = @transform_0, window_bounds = array<i64: 8, 8>}, {pipeline_mode = #tpu.pipeline_mode<synchronous>, transform_indices = @transform_1, window_bounds = array<i64: 8, 128>}, {pipeline_mode = #tpu.pipeline_mode<synchronous>, transform_indices = @transform_2, window_bounds = array<i64: 1, 128>}, {pipeline_mode = #tpu.pipeline_mode<synchronous>, transform_indices = @transform_3, window_bounds = array<i64: 128, 128>}, {pipeline_mode = #tpu.pipeline_mode<synchronous>, transform_indices = @transform_4, window_bounds = array<i64: 1, 4>}, {pipeline_mode = #tpu.pipeline_mode<synchronous>, transform_indices = @transform_5, window_bounds = array<i64: 128, 4>}, {transform_indices = @transform_6, window_bounds = array<i64: 8, 4>}]} {
    %c0 = arith.constant 0 : index
    %c0_0 = arith.constant 0 : index
    %0 = vector.load %arg1[%c0, %c0_0] : memref<8x8xf32, #tpu.memory_space<vmem>>, vector<8x8xf32>
    %c0_1 = arith.constant 0 : index
    %c0_2 = arith.constant 0 : index
    %1 = vector.load %arg2[%c0_1, %c0_2] : memref<8x128xf32, #tpu.memory_space<vmem>>, vector<8x128xf32>
    %2 = vector.extract_strided_slice %0 {offsets = [0, 0], sizes = [8, 1], strides = [1, 1]} : vector<8x8xf32> to vector<8x1xf32>
    %3 = vector.extract_strided_slice %1 {offsets = [0, 0], sizes = [1, 128], strides = [1, 1]} : vector<8x128xf32> to vector<1x128xf32>
    %4 = vector.broadcast %2 : vector<8x1xf32> to vector<8x128xf32>
    %5 = vector.broadcast %3 : vector<1x128xf32> to vector<8x128xf32>
    %6 = arith.mulf %4, %5 : vector<8x128xf32>
    %7 = vector.extract_strided_slice %0 {offsets = [0, 1], sizes = [8, 1], strides = [1, 1]} : vector<8x8xf32> to vector<8x1xf32>
    %8 = vector.extract_strided_slice %1 {offsets = [1, 0], sizes = [1, 128], strides = [1, 1]} : vector<8x128xf32> to vector<1x128xf32>
    %9 = vector.broadcast %7 : vector<8x1xf32> to vector<8x128xf32>
    %10 = vector.broadcast %8 : vector<1x128xf32> to vector<8x128xf32>
    %11 = arith.mulf %9, %10 : vector<8x128xf32>
    %12 = arith.addf %6, %11 : vector<8x128xf32>
    %13 = vector.extract_strided_slice %0 {offsets = [0, 2], sizes = [8, 1], strides = [1, 1]} : vector<8x8xf32> to vector<8x1xf32>
    %14 = vector.extract_strided_slice %1 {offsets = [2, 0], sizes = [1, 128], strides = [1, 1]} : vector<8x128xf32> to vector<1x128xf32>
    %15 = vector.broadcast %13 : vector<8x1xf32> to vector<8x128xf32>
    %16 = vector.broadcast %14 : vector<1x128xf32> to vector<8x128xf32>
    %17 = arith.mulf %15, %16 : vector<8x128xf32>
    %18 = arith.addf %12, %17 : vector<8x128xf32>
    %19 = vector.extract_strided_slice %0 {offsets = [0, 3], sizes = [8, 1], strides = [1, 1]} : vector<8x8xf32> to vector<8x1xf32>
    %20 = vector.extract_strided_slice %1 {offsets = [3, 0], sizes = [1, 128], strides = [1, 1]} : vector<8x128xf32> to vector<1x128xf32>
    %21 = vector.broadcast %19 : vector<8x1xf32> to vector<8x128xf32>
    %22 = vector.broadcast %20 : vector<1x128xf32> to vector<8x128xf32>
    %23 = arith.mulf %21, %22 : vector<8x128xf32>
    %24 = arith.addf %18, %23 : vector<8x128xf32>
    %25 = vector.extract_strided_slice %0 {offsets = [0, 4], sizes = [8, 1], strides = [1, 1]} : vector<8x8xf32> to vector<8x1xf32>
    %26 = vector.extract_strided_slice %1 {offsets = [4, 0], sizes = [1, 128], strides = [1, 1]} : vector<8x128xf32> to vector<1x128xf32>
    %27 = vector.broadcast %25 : vector<8x1xf32> to vector<8x128xf32>
    %28 = vector.broadcast %26 : vector<1x128xf32> to vector<8x128xf32>
    %29 = arith.mulf %27, %28 : vector<8x128xf32>
    %30 = arith.addf %24, %29 : vector<8x128xf32>
    %31 = vector.extract_strided_slice %0 {offsets = [0, 5], sizes = [8, 1], strides = [1, 1]} : vector<8x8xf32> to vector<8x1xf32>
    %32 = vector.extract_strided_slice %1 {offsets = [5, 0], sizes = [1, 128], strides = [1, 1]} : vector<8x128xf32> to vector<1x128xf32>
    %33 = vector.broadcast %31 : vector<8x1xf32> to vector<8x128xf32>
    %34 = vector.broadcast %32 : vector<1x128xf32> to vector<8x128xf32>
    %35 = arith.mulf %33, %34 : vector<8x128xf32>
    %36 = arith.addf %30, %35 : vector<8x128xf32>
    %37 = vector.extract_strided_slice %0 {offsets = [0, 6], sizes = [8, 1], strides = [1, 1]} : vector<8x8xf32> to vector<8x1xf32>
    %38 = vector.extract_strided_slice %1 {offsets = [6, 0], sizes = [1, 128], strides = [1, 1]} : vector<8x128xf32> to vector<1x128xf32>
    %39 = vector.broadcast %37 : vector<8x1xf32> to vector<8x128xf32>
    %40 = vector.broadcast %38 : vector<1x128xf32> to vector<8x128xf32>
    %41 = arith.mulf %39, %40 : vector<8x128xf32>
    %42 = arith.addf %36, %41 : vector<8x128xf32>
    %cst = arith.constant 0.000000e+00 : f32
    %43 = vector.broadcast %cst : f32 to vector<8x128xf32>
    %44 = arith.maximumf %42, %43 : vector<8x128xf32>
    %45 = arith.truncf %44 : vector<8x128xf32> to vector<8x128xbf16>
    %c0_3 = arith.constant 0 : index
    %c0_4 = arith.constant 0 : index
    %46 = vector.load %arg4[%c0_3, %c0_4] : memref<128x128xbf16, #tpu.memory_space<vmem>>, vector<128x128xbf16>
    %cst_5 = arith.constant dense<0.000000e+00> : vector<8x128xf32>
    %47 = tpu.matmul %45, %46, %cst_5 {dimension_numbers = #tpu.dot_dimension_numbers<[1], [0], [0], [1], [0, 0, 1, 1], [], []>} : vector<8x128xbf16>, vector<128x128xbf16>, vector<8x128xf32> -> vector<8x128xf32>
    %c0_6 = arith.constant 0 : index
    %c0_7 = arith.constant 0 : index
    %48 = vector.load %arg3[%c0_6, %c0_7] : memref<1x128xf32, #tpu.memory_space<vmem>>, vector<1x128xf32>
    %49 = vector.broadcast %48 : vector<1x128xf32> to vector<8x128xf32>
    %50 = arith.addf %47, %49 : vector<8x128xf32>
    %cst_8 = arith.constant 0.000000e+00 : f32
    %51 = vector.broadcast %cst_8 : f32 to vector<8x128xf32>
    %52 = arith.maximumf %50, %51 : vector<8x128xf32>
    %53 = arith.truncf %52 : vector<8x128xf32> to vector<8x128xbf16>
    %c0_9 = arith.constant 0 : index
    %c0_10 = arith.constant 0 : index
    %54 = vector.load %arg6[%c0_9, %c0_10] : memref<128x4xbf16, #tpu.memory_space<vmem>>, vector<128x4xbf16>
    %cst_11 = arith.constant dense<0.000000e+00> : vector<8x4xf32>
    %55 = tpu.matmul %53, %54, %cst_11 {dimension_numbers = #tpu.dot_dimension_numbers<[1], [0], [0], [1], [0, 0, 1, 1], [], []>} : vector<8x128xbf16>, vector<128x4xbf16>, vector<8x4xf32> -> vector<8x4xf32>
    %c0_12 = arith.constant 0 : index
    %c0_13 = arith.constant 0 : index
    %56 = vector.load %arg5[%c0_12, %c0_13] : memref<1x4xf32, #tpu.memory_space<vmem>>, vector<1x4xf32>
    %57 = vector.broadcast %56 : vector<1x4xf32> to vector<8x4xf32>
    %58 = arith.addf %55, %57 : vector<8x4xf32>
    %59 = math.tanh %58 : vector<8x4xf32>
    %c0_14 = arith.constant 0 : index
    %c0_15 = arith.constant 0 : index
    %60 = vector.load %arg7[%c0_14, %c0_15] : memref<8x4xf32, #tpu.memory_space<vmem>>, vector<8x4xf32>
    tpu.vector_store %arg7[%c0_14, %c0_15], %59 {strides = array<i32>} : memref<8x4xf32, #tpu.memory_space<vmem>>, vector<8x4xf32>,
    return
  }
  func.func @transform_0(%arg0: i32) -> (i32, i32) {
    %c0_i32 = arith.constant 0 : i32
    %c0_i32_0 = arith.constant 0 : i32
    return %arg0, %c0_i32 : i32, i32
  }
  func.func @transform_1(%arg0: i32) -> (i32, i32) {
    %c0_i32 = arith.constant 0 : i32
    %c0_i32_0 = arith.constant 0 : i32
    %c0_i32_1 = arith.constant 0 : i32
    return %c0_i32, %c0_i32_0 : i32, i32
  }
  func.func @transform_2(%arg0: i32) -> (i32, i32) {
    %c0_i32 = arith.constant 0 : i32
    %c0_i32_0 = arith.constant 0 : i32
    %c0_i32_1 = arith.constant 0 : i32
    return %c0_i32, %c0_i32_0 : i32, i32
  }
  func.func @transform_3(%arg0: i32) -> (i32, i32) {
    %c0_i32 = arith.constant 0 : i32
    %c0_i32_0 = arith.constant 0 : i32
    %c0_i32_1 = arith.constant 0 : i32
    return %c0_i32, %c0_i32_0 : i32, i32
  }
  func.func @transform_4(%arg0: i32) -> (i32, i32) {
    %c0_i32 = arith.constant 0 : i32
    %c0_i32_0 = arith.constant 0 : i32
    %c0_i32_1 = arith.constant 0 : i32
    return %c0_i32, %c0_i32_0 : i32, i32
  }
  func.func @transform_5(%arg0: i32) -> (i32, i32) {
    %c0_i32 = arith.constant 0 : i32
    %c0_i32_0 = arith.constant 0 : i32
    %c0_i32_1 = arith.constant 0 : i32
    return %c0_i32, %c0_i32_0 : i32, i32
  }
  func.func @transform_6(%arg0: i32) -> (i32, i32) {
    %c0_i32 = arith.constant 0 : i32
    %c0_i32_0 = arith.constant 0 : i32
    return %arg0, %c0_i32 : i32, i32
  }
}

</mosaic_0001>

<bundles_post_ra>
// kernel: tpu_custom_call.1
= control target key start
LH: loop header
LB: loop body
LE: loop exit
PB: predicated region body
PF: predicated region fallthrough
CT: control target
= control target key end

     0   :  { %11 = vsyncpa [#allocation3], 0  ;;  %s478_s21 = smov [#allocation2]   ;;  %s613_s0 = inlined_call_operand.vmem [shape: f32[8,8], index: 0, kind: input, shape index: {}]   ;;  %s614_s1 = inlined_call_operand.hbm [shape: f32[8,128], index: 1, kind: input, shape index: {}]   ;;  %s615_s2 = inlined_call_operand.vmem [shape: f32[1,128], index: 2, kind: input, shape index: {}]   ;;  %s616_s3 = inlined_call_operand.vmem [shape: bf16[128,128], index: 3, kind: input, shape index: {}]   ;;  %s617_s4 = inlined_call_operand.vmem [shape: f32[1,4], index: 4, kind: input, shape index: {}]   ;;  %s618_s5 = inlined_call_operand.vmem [shape: bf16[128,4], index: 5, kind: input, shape index: {}]   ;;  %s619_s6 = inlined_call_operand.vmem [shape: f32[8,4], index: 6, kind: output, shape index: {}]  }
   0x1   :  { %s20_s22 = sshll.u32 %s478_s21, 4  ;;  %s454_s25 = scalar_lea.hbm %s614_s1, 128  ;;  %s21_s22 = int_to_ptr.vmem [resolvable:$true] %s20_s22 }
   0x2   :  { %p455_p0 = scmp.ne.s32.totalorder %s614_s1, %s454_s25  ;;  %p458_p1 = scmp.lt.u32.totalorder %s454_s25, %s614_s1 }
   0x4   :  { %p460_p2 = pnand %p458_p1, %p455_p0 }
   0x6   :  { %463 = shalt.err (!%p460_p2)
}
   0x7   :  { %s464_s30 = scalar_lea.vmem %s21_s22, 128  ;;  %p469_p4 = scmp.lt.s32.totalorder %s21_s22, %s21_s22 }
   0x8   :  { %p465_p3 = scmp.ne.s32.totalorder %s21_s22, %s464_s30  ;;  %p470_p5 = scmp.lt.s32.totalorder %s464_s30, %s464_s30 }
   0xa   :  { %p471_p6 = por %p470_p5, %p469_p4 }
   0xc   :  { %p472_p7 = pnand %p471_p6, %p465_p3 }
   0xe   :  { %475 = shalt.err (!%p472_p7)
}
   0xf   :  { %23 = dma.hbm_to_vmem [thread:$0]  %s614_s1, 128, %s21_s22, [#allocation3]  }
  0x10   :  { %476 = dma.done.wait [#allocation3], 128  }
  0x11   :  { %477 = vsyncadd [#allocation3], 4294967168  ;;  %v479_v0 = vmov 2   ;;  %v480_v1 = vmov 0   ;;  %v481_v2 = vmov 0.0   ;;  %v36_v3 = vld [vmem:[%s613_s0] sm:$0xff]  ;;  %v43_v23 = vlaneseq }
  0x12   :  { %430 = vset.pattern.permute.xlu1 %v479_v0  ;;  %428 = vset.pattern.permute.xlu0 %v480_v1  ;;  %v436_v4 = vld [vmem:[%s616_s3] sm:$0xff]   ;;  %v437_v5 = vld [vmem:[%s616_s3 + $0x8] sm:$0xff]   ;;  %v482_v6 = vmov 3   ;;  %v483_v7 = vmov 1   ;;  %v438_v8 = vld [vmem:[%s616_s3 + $0x10] sm:$0xff]   ;;  %v484_v9 = vmov 4  }
  0x13   :  { %378 = vmatprep.subr.bf16.mxu0 %v481_v2  ;;  %398 = vmatprep.subr.bf16.mxu1 %v481_v2  ;;  %v485_v10 = vmov 5   ;;  %v439_v11 = vld [vmem:[%s616_s3 + $0x18] sm:$0xff]   ;;  %v486_v12 = vmov 6   ;;  %v440_v13 = vld [vmem:[%s616_s3 + $0x20] sm:$0xff]   ;;  %v441_v14 = vld [vmem:[%s616_s3 + $0x28] sm:$0xff]   ;;  %vm487_vm0 = vmmov 0  }
  0x14   :  { %59 = vperm.xlu1 %430, %v36_v3   ;;  %40 = vperm.xlu0 %428, %v36_v3   ;;  %v442_v15 = vld [vmem:[%s616_s3 + $0x30] sm:$0xff]   ;;  %v444_v16 = vld [vmem:[%s618_s5] sm:$0xff]   ;;  %v445_v17 = vld [vmem:[%s618_s5 + $0x8] sm:$0xff]   ;;  %v44_v24 = vshrl.u32 %v43_v23, 7  ;;  %vm335_vm1 = vcmask 31744  }
  0x15   :  { %379 = vmatpush3.bf16.msra.mxu0 %v436_v4  ;;  %394 = vmatprep.mubr.msk.bf16.mxu0 %vm487_vm0, %v481_v2  ;;  %v443_v18 = vld [vmem:[%s616_s3 + $0x38] sm:$0xff]   ;;  %v446_v19 = vld [vmem:[%s618_s5 + $0x10] sm:$0xff]   ;;  %v448_v21 = vld [vmem:[%s618_s5 + $0x20] sm:$0xff]  }
  0x16   :  { %380 = vmatprep.subr.bf16.mxu0 %v481_v2  ;;  %414 = vmatprep.mubr.msk.bf16.mxu1 %vm487_vm0, %v481_v2  ;;  %v447_v20 = vld [vmem:[%s618_s5 + $0x18] sm:$0xff]   ;;  %v449_v22 = vld [vmem:[%s618_s5 + $0x28] sm:$0xff]   ;;  %v45_v25 = vsub.s32 0, %v44_v24  ;;  %v54_v26 = vsub.s32 1, %v44_v24  ;;  %v37_v27 = vld [vmem:[#allocation2] sm:$0xff]  ;;  %v64_v28 = vsub.s32 2, %v44_v24 }
  0x17   :  { %399 = vmatpush3.bf16.msra.mxu1 %v444_v16  ;;  %v74_v32 = vsub.s32 3, %v44_v24  ;;  %v84_v34 = vsub.s32 4, %v44_v24  ;;  %v94_v36 = vsub.s32 5, %v44_v24  ;;  %v104_v46 = vsub.s32 6, %v44_v24  ;;  %v450_v62 = vld [vmem:[%s618_s5 + $0x30] sm:$0xff]   ;;  %v451_v63 = vld [vmem:[%s618_s5 + $0x38] sm:$0xff]  }
  0x18   :  { %431 = vset.pattern.permute.xlu1 %v482_v6  ;;  %429 = vset.pattern.permute.xlu0 %v483_v7  ;;  %v46_v31 = vrot.slane %v37_v27, %v45_v25  ;;  %v55_v33 = vrot.slane %v37_v27, %v54_v26  ;;  %v65_v35 = vrot.slane %v37_v27, %v64_v28  ;;  %v342_v0 = vld [vmem:[%s615_s2] ss:$0 sm:$0xff] }
  0x19   :  { %69 = vperm.xlu1 %431, %v36_v3   ;;  %49 = vperm.xlu0 %429, %v36_v3   ;;  %v75_v40 = vrot.slane %v37_v27, %v74_v32  ;;  %v85_v42 = vrot.slane %v37_v27, %v84_v34  ;;  %v95_v45 = vrot.slane %v37_v27, %v94_v36 }
  0x1a   :  { %381 = vmatpush3.bf16.msra.mxu0 %v437_v5  ;;  %400 = vmatprep.subr.bf16.mxu1 %v481_v2  ;;  %v105_v54 = vrot.slane %v37_v27, %v104_v46 }
  0x1b   :  { %382 = vmatprep.subr.bf16.mxu0 %v481_v2  ;;  %401 = vmatpush3.bf16.msra.mxu1 %v445_v17 }
  0x1c   :  { %402 = vmatprep.subr.bf16.mxu1 %v481_v2 }
  0x1d   :  { %432 = vset.pattern.permute.xlu1 %v484_v9  ;;  %433 = vset.pattern.permute.xlu0 %v485_v10 }
  0x1e   :  { %79 = vperm.xlu1 %432, %v36_v3   ;;  %89 = vperm.xlu0 %433, %v36_v3  }
  0x1f   :  { %383 = vmatpush3.bf16.msra.mxu0 %v438_v8  ;;  %403 = vmatpush3.bf16.msra.mxu1 %v446_v19 }
  0x20   :  { %384 = vmatprep.subr.bf16.mxu0 %v481_v2  ;;  %404 = vmatprep.subr.bf16.mxu1 %v481_v2 }
  0x22   :  { %434 = vset.pattern.permute.xlu1 %v486_v12  ;;  %435 = vset.pattern.permute.xlu0 %v486_v12 }
  0x23   :  { %99 = vperm.xlu1 %434, %v36_v3   ;;  %385 = vmatpush3.bf16.msra.mxu0 %v439_v11 }
  0x24   :  { %386 = vmatprep.subr.bf16.mxu0 %v481_v2  ;;  %405 = vmatpush3.bf16.msra.mxu1 %v447_v20 }
  0x25   :  { %406 = vmatprep.subr.bf16.mxu1 %v481_v2 }
  0x27   :  { %387 = vmatpush3.bf16.msra.mxu0 %v440_v13 }
  0x28   :  { %388 = vmatprep.subr.bf16.mxu0 %v481_v2  ;;  %407 = vmatpush3.bf16.msra.mxu1 %v448_v21 }
  0x29   :  { %408 = vmatprep.subr.bf16.mxu1 %v481_v2 }
  0x2b   :  { %389 = vmatpush3.bf16.msra.mxu0 %v441_v14 }
  0x2c   :  { %390 = vmatprep.subr.bf16.mxu0 %v481_v2  ;;  %409 = vmatpush3.bf16.msra.mxu1 %v449_v22 }
  0x2d   :  { %410 = vmatprep.subr.bf16.mxu1 %v481_v2 }
  0x2f   :  { %391 = vmatpush3.bf16.msra.mxu0 %v442_v15 }
  0x30   :  { %392 = vmatprep.subr.bf16.mxu0 %v481_v2  ;;  %411 = vmatpush3.bf16.msra.mxu1 %v450_v62 }
  0x31   :  { %412 = vmatprep.subr.bf16.mxu1 %v481_v2  ;;  %v351_v2 = vld [vmem:[%s617_s4] ss:$0 sm:$0xff] }
  0x33   :  { %393 = vmatpush3.bf16.msra.mxu0 %v443_v18 }
  0x34   :  { %413 = vmatpush3.bf16.msra.mxu1 %v451_v63 }
  0x93   :  { %v60_v29 = vpop.permute.xlu1 %59  ;;  %v41_v30 = vpop.permute.xlu0 %40 }
  0x94   :  { %v47_v39 = vmul.f32 %v46_v31, %v41_v30  ;;  %v66_v43 = vmul.f32 %v65_v35, %v60_v29 }
  0x98   :  { %v70_v37 = vpop.permute.xlu1 %69  ;;  %v50_v38 = vpop.permute.xlu0 %49 }
  0x99   :  { %v56_v41 = vmul.f32 %v55_v33, %v50_v38  ;;  %v76_v47 = vmul.f32 %v75_v40, %v70_v37 }
  0x9b   :  { %v57_v44 = vadd.f32 %v56_v41, %v47_v39 }
  0x9d   :  { %v67_v48 = vadd.f32 %v66_v43, %v57_v44  ;;  %v80_v49 = vpop.permute.xlu1 %79  ;;  %v90_v50 = vpop.permute.xlu0 %89 }
  0x9e   :  { %v86_v51 = vmul.f32 %v85_v42, %v80_v49  ;;  %v96_v53 = vmul.f32 %v95_v45, %v90_v50 }
  0x9f   :  { %v77_v52 = vadd.f32 %v76_v47, %v67_v48 }
  0xa1   :  { %v87_v55 = vadd.f32 %v86_v51, %v77_v52 }
  0xa2   :  { %v100_v56 = vpop.permute.xlu1 %99 }
  0xa3   :  { %v97_v57 = vadd.f32 %v96_v53, %v87_v55  ;;  %v106_v58 = vmul.f32 %v105_v54, %v100_v56 }
  0xa5   :  { %v107_v59 = vadd.f32 %v106_v58, %v97_v57 }
  0xa7   :  { %v108_v60 = vmax.f32 %v107_v59, 0.0 }
  0xa9   :  { %v109_v61 = vpack.c.bf16 %v108_v60, %v108_v60 }
  0xab   :  { %395 = vmatmul.mubr.bf16.vlgmr.msra.gmra.mrb[0].mxu0 %v109_v61 }
 0x17e   :  { %v215_v1 = vpop.f32.mrb[0].mxu0 }
 0x17f   :  { %v216_v3 = vadd.f32 %v342_v0, %v215_v1  ;;  %v396_v4 = vpop.f32.mrb[1].mxu0 }
 0x180   :  { %v218_v5 = vpop.f32.mrb[2].mxu0 }
 0x181   :  { %v221_v6 = vmax.f32 %v216_v3, 0.0  ;;  %v397_v7 = vpop.f32.mrb[3].mxu0 }
 0x183   :  { %v222_v8 = vpack.c.bf16 %v221_v6, %v221_v6 }
 0x185   :  { %415 = vmatmul.mubr.bf16.vlgmr.msra.gmra.mrb[0].mxu1 %v222_v8 }
 0x258   :  { %v328_v9 = vpop.f32.mrb[0].mxu1 }
 0x259   :  { %v329_v10 = vadd.f32 %v351_v2, %v328_v9  ;;  %v416_v11 = vpop.f32.mrb[1].mxu1 }
 0x25a   :  { %v331_v12 = vpop.f32.mrb[2].mxu1 }
 0x25b   :  { %452 = vtanh.f32 %v329_v10  ;;  %v417_v13 = vpop.f32.mrb[3].mxu1 }
 0x265   :  { %v453_v14 = vpop.eup %452 }
 0x266   :  { %336 = vst.msk [vmem:[%s619_s6] sm:$0xff] %vm335_vm1, %v453_v14 }
 0x267   :  { %341 = vsyncpa [#allocation3], 1 }

</bundles_post_ra>
